<compile_context>
chip_gen: v6e
topology: v6e:2x2x1
jax: 0.10.0
libtpu: 0.0.40
codegen_flags: <defaults>
</compile_context>

<pallas_src>
import functools

import jax
import jax.numpy as jnp
from jax.experimental import pallas as pl
from jax.experimental.pallas import tpu as pltpu


def _compute_default_rope_parameters(head_dim: int,
                                     rope_theta: float = 1_000_000.0,
                                     partial_rotary_factor: float = 1.0):
    dim = int(head_dim * partial_rotary_factor)
    attention_factor = 1.0
    inv_freq = 1.0 / (rope_theta ** (jnp.arange(0, dim, 2, dtype=jnp.float32) / dim))
    return inv_freq, attention_factor


def _rope_kernel(pos_ref, invf_ref, cos_ref, sin_ref, *,
                 attention_scaling, out_dtype):
    # pos_ref  : (1, TS, 1)  int32    (S on sublanes -> pure VPU outer product)
    # invf_ref : (1, D)      float32  (pre-duplicated [inv_freq, inv_freq];
    #                                  constant index_map -> fetched once)
    # cos_ref  : (1, TS, D)  out_dtype
    # sin_ref  : (1, TS, D)  out_dtype
    pos = pos_ref[0].astype(jnp.float32)          # (TS, 1)
    invf = invf_ref[...]                          # (1, D)
    freqs = pos * invf                            # (TS, D) broadcast multiply (VPU)

    cos = jnp.cos(freqs)                          # EUP
    sin = jnp.sin(freqs)                          # EUP
    if attention_scaling != 1.0:                  # Python-level: skipped when 1.0
        cos = cos * attention_scaling
        sin = sin * attention_scaling

    # Plain full-width stores (no lane concatenate / relayout).
    cos_ref[...] = cos[None].astype(out_dtype)
    sin_ref[...] = sin[None].astype(out_dtype)


def _pick_tiling(S: int):
    """Generation-aware seq tile cap and VMEM limit."""
    try:
        vmem_bytes = pltpu.get_tpu_info().vmem_capacity_bytes
    except Exception:  # be robust if the query is unavailable
        vmem_bytes = 64 << 20
    if vmem_bytes >= (128 << 20):        # v5e / v6e: 128 MiB physical VMEM
        cap, vmem_limit = 8192, 64 << 20
    else:                                # v7x: 64 MiB physical VMEM per TC
        cap, vmem_limit = 4096, 48 << 20
    if S <= cap:
        return S, vmem_limit             # full extent is always a legal block
    return cap, vmem_limit               # cap is a multiple of 8 (sublane-aligned)


class Qwen2RotaryEmbeddingPallas:
    def __init__(self, dim: int, head_dim: int, max_position_embeddings: int,
                 rope_theta: float):
        self.max_seq_len_cached = max_position_embeddings
        self.original_max_seq_len = max_position_embeddings
        inv_freq, self.attention_scaling = _compute_default_rope_parameters(
            head_dim, rope_theta)
        self.inv_freq = inv_freq                    # (head_dim // 2,) float32
        self.head_dim = head_dim

    def __call__(self, x, position_ids):
        # x is only consulted for its dtype (as in the torch module)
        B, S = position_ids.shape
        half = self.inv_freq.shape[0]
        D = 2 * half
        out_dtype = x.dtype
        out_itemsize = jnp.dtype(out_dtype).itemsize

        TS, vmem_limit = _pick_tiling(S)
        grid = (B, pl.cdiv(S, TS))

        # S on the sublane axis: (B, S, 1) int32, block (1, TS, 1).
        pos3d = position_ids.astype(jnp.int32).reshape(B, S, 1)
        # Pre-duplicated inv_freq (concat done once in XLA, not per grid step).
        invf2d = jnp.concatenate([self.inv_freq, self.inv_freq]).reshape(1, D)
        invf2d = invf2d.astype(jnp.float32)

        kernel = functools.partial(
            _rope_kernel,
            attention_scaling=float(self.attention_scaling),
            out_dtype=out_dtype)

        cos, sin = pl.pallas_call(
            kernel,
            out_shape=(jax.ShapeDtypeStruct((B, S, D), out_dtype),
                       jax.ShapeDtypeStruct((B, S, D), out_dtype)),
            grid_spec=pltpu.PrefetchScalarGridSpec(
                num_scalar_prefetch=0,
                grid=grid,
                in_specs=[
                    pl.BlockSpec((1, TS, 1), lambda b, s: (b, s, 0)),
                    pl.BlockSpec((1, D), lambda b, s: (0, 0)),
                ],
                out_specs=[
                    pl.BlockSpec((1, TS, D), lambda b, s: (b, s, 0)),
                    pl.BlockSpec((1, TS, D), lambda b, s: (b, s, 0)),
                ],
            ),
            compiler_params=pltpu.CompilerParams(
                dimension_semantics=("parallel", "parallel"),
                vmem_limit_bytes=vmem_limit,
            ),
            cost_estimate=pl.CostEstimate(
                flops=2 * B * S * D,                 # outer product + scaling
                transcendentals=2 * B * S * D,       # cos + sin
                bytes_accessed=2 * B * S * D * out_itemsize + B * S * 4 + D * 4,
            ),
        )(pos3d, invf2d)
        return cos, sin


if __name__ == "__main__":
    key = jax.random.PRNGKey(0)

    # Small, module-consistent shapes.
    batch = 2
    seq = 8
    num_heads = 4
    head_dim = 32
    dim = num_heads * head_dim
    max_position_embeddings = 128
    rope_theta = 1_000_000.0

    k1, _ = jax.random.split(key)
    # x: only its dtype matters for the forward pass (as in the torch module)
    x = jax.random.normal(k1, (batch, num_heads, seq, head_dim), dtype=jnp.float32)
    position_ids = jnp.broadcast_to(jnp.arange(seq, dtype=jnp.int32)[None, :],
                                    (batch, seq))

    rope = Qwen2RotaryEmbeddingPallas(dim, head_dim, max_position_embeddings,
                                      rope_theta)
    cos, sin = rope(x, position_ids)
    cos = jax.block_until_ready(cos)
    sin = jax.block_until_ready(sin)

    # Reference (plain JAX, mirrors the torch math).
    inv_freq = rope.inv_freq
    freqs = position_ids.astype(jnp.float32)[:, :, None] * inv_freq[None, None, :]
    emb = jnp.concatenate([freqs, freqs], axis=-1)
    cos_ref = (jnp.cos(emb) * rope.attention_scaling).astype(x.dtype)
    sin_ref = (jnp.sin(emb) * rope.attention_scaling).astype(x.dtype)

    assert cos.shape == (batch, seq, head_dim), cos.shape
    assert sin.shape == (batch, seq, head_dim), sin.shape
    assert cos.dtype == x.dtype and sin.dtype == x.dtype
    assert jnp.allclose(cos, cos_ref, atol=1e-5, rtol=1e-5)
    assert jnp.allclose(sin, sin_ref, atol=1e-5, rtol=1e-5)

    print("KERNEL_OK")
</pallas_src>

<mosaic_0001>
module attributes {stable_mosaic.version = 11 : i64} {
  func.func @_rope_kernel(%arg0: i32, %arg1: i32, %arg2: memref<1x8x1xi32, #tpu.memory_space<vmem>>, %arg3: memref<1x32xf32, #tpu.memory_space<vmem>>, %arg4: memref<1x8x32xf32, #tpu.memory_space<vmem>>, %arg5: memref<1x8x32xf32, #tpu.memory_space<vmem>>) attributes {dimension_semantics = [#tpu.dimension_semantics<parallel>, #tpu.dimension_semantics<parallel>], iteration_bounds = array<i64: 2, 1>, scalar_prefetch = 0 : i64, scratch_operands = 0 : i64, tpu.core_type = #tpu.core_type<tc>, window_params = [{transform_indices = @transform_0, window_bounds = array<i64: 1, 8, 1>}, {pipeline_mode = #tpu.pipeline_mode<synchronous>, transform_indices = @transform_1, window_bounds = array<i64: 1, 32>}, {transform_indices = @transform_2, window_bounds = array<i64: 1, 8, 32>}, {transform_indices = @transform_3, window_bounds = array<i64: 1, 8, 32>}]} {
    %c0 = arith.constant 0 : index
    %c0_0 = arith.constant 0 : index
    %c0_1 = arith.constant 0 : index
    %0 = vector.load %arg2[%c0, %c0_0, %c0_1] : memref<1x8x1xi32, #tpu.memory_space<vmem>>, vector<1x8x1xi32>
    %1 = vector.shape_cast %0 : vector<1x8x1xi32> to vector<8x1xi32>
    %2 = arith.sitofp %1 : vector<8x1xi32> to vector<8x1xf32>
    %c0_2 = arith.constant 0 : index
    %c0_3 = arith.constant 0 : index
    %3 = vector.load %arg3[%c0_2, %c0_3] : memref<1x32xf32, #tpu.memory_space<vmem>>, vector<1x32xf32>
    %4 = vector.broadcast %2 : vector<8x1xf32> to vector<8x32xf32>
    %5 = vector.broadcast %3 : vector<1x32xf32> to vector<8x32xf32>
    %6 = arith.mulf %4, %5 : vector<8x32xf32>
    %7 = math.cos %6 : vector<8x32xf32>
    %8 = math.sin %6 : vector<8x32xf32>
    %9 = vector.shape_cast %7 : vector<8x32xf32> to vector<1x8x32xf32>
    %c0_4 = arith.constant 0 : index
    %c0_5 = arith.constant 0 : index
    %c0_6 = arith.constant 0 : index
    %10 = vector.load %arg4[%c0_4, %c0_5, %c0_6] : memref<1x8x32xf32, #tpu.memory_space<vmem>>, vector<1x8x32xf32>
    tpu.vector_store %arg4[%c0_4, %c0_5, %c0_6], %9 {strides = array<i32>} : memref<1x8x32xf32, #tpu.memory_space<vmem>>, vector<1x8x32xf32>,
    %11 = vector.shape_cast %8 : vector<8x32xf32> to vector<1x8x32xf32>
    %c0_7 = arith.constant 0 : index
    %c0_8 = arith.constant 0 : index
    %c0_9 = arith.constant 0 : index
    %12 = vector.load %arg5[%c0_7, %c0_8, %c0_9] : memref<1x8x32xf32, #tpu.memory_space<vmem>>, vector<1x8x32xf32>
    tpu.vector_store %arg5[%c0_7, %c0_8, %c0_9], %11 {strides = array<i32>} : memref<1x8x32xf32, #tpu.memory_space<vmem>>, vector<1x8x32xf32>,
    return
  }
  func.func @transform_0(%arg0: i32, %arg1: i32) -> (i32, i32, i32) {
    %c0_i32 = arith.constant 0 : i32
    %c0_i32_0 = arith.constant 0 : i32
    return %arg0, %arg1, %c0_i32 : i32, i32, i32
  }
  func.func @transform_1(%arg0: i32, %arg1: i32) -> (i32, i32) {
    %c0_i32 = arith.constant 0 : i32
    %c0_i32_0 = arith.constant 0 : i32
    %c0_i32_1 = arith.constant 0 : i32
    return %c0_i32, %c0_i32_0 : i32, i32
  }
  func.func @transform_2(%arg0: i32, %arg1: i32) -> (i32, i32, i32) {
    %c0_i32 = arith.constant 0 : i32
    %c0_i32_0 = arith.constant 0 : i32
    return %arg0, %arg1, %c0_i32 : i32, i32, i32
  }
  func.func @transform_3(%arg0: i32, %arg1: i32) -> (i32, i32, i32) {
    %c0_i32 = arith.constant 0 : i32
    %c0_i32_0 = arith.constant 0 : i32
    return %arg0, %arg1, %c0_i32 : i32, i32, i32
  }
}

</mosaic_0001>

<bundles_post_ra>
// kernel: tpu_custom_call.1
= control target key start
LH: loop header
LB: loop body
LE: loop exit
PB: predicated region body
PF: predicated region fallthrough
CT: control target
= control target key end

     0   :  { %9 = vsyncpa [#allocation3], 0  ;;  %s972_s0 = inlined_call_operand.vmem [shape: s32[2,8,1], index: 0, kind: input, shape index: {}]   ;;  %s973_s1 = inlined_call_operand.vmem [shape: f32[1,32], index: 1, kind: input, shape index: {}]   ;;  %s974_s2 = inlined_call_operand.hbm [shape: f32[2,8,32], index: 2, kind: output, shape index: {0}]   ;;  %s975_s3 = inlined_call_operand.hbm [shape: f32[2,8,32], index: 3, kind: output, shape index: {1}]  }
   0x1   :  { %11 = vsyncpa [#allocation3 + $0x1], 0 }
   0x2   :  { %12 = vsyncpa [#allocation5], 0 }
   0x3   :  { %14 = vsyncpa [#allocation5 + $0x1], 0  ;;  %s803_s12 = smov 0   ;;  %s805_s13 = smov 0  }
   0x4   :  { %s807_s14 = smov 0   ;;  %s809_s15 = smov 0  }
   0x5   :  { %s811_s16 = smov 0   ;;  %s813_s17 = smov 0  }
   0x6 LB: > { %s567_s18 = sadd.s32 4294967295, %s772_s17   ;;  %s568_s19 = sadd.s32 4294967294, %s772_s17   ;;  %s772_s17 = sphi %s813_s17, %s20_s17   ;;  %s768_s16 = sphi %s811_s16, %s982_s16   ;;  %s764_s15 = sphi %s809_s15, %s981_s15   ;;  %s760_s14 = sphi %s807_s14, %s980_s14   ;;  %s756_s13 = sphi %s805_s13, %s979_s13   ;;  %s752_s12 = sphi %s803_s12, %s978_s12  }
   0x7   : > { %s32_s20 = sadd.s32 1, %s768_s16  ;;  %s90_s21 = sadd.s32 1, %s760_s14 }
   0x8   : > { %p34_p0 = scmp.ge.s32.totalorder %s32_s20, 2  ;;  %p100_p1 = scmp.ne.s32.totalorder %s760_s14, %s756_s13 }
   0x9   : > { %p101_p2 = scmp.eq.s32.totalorder %s567_s18, 1  ;;  %p106_p3 = scmp.ne.s32.totalorder %s756_s13, %s752_s12 }
   0xa   : > { %s984_s20 = smov (%p34_p0, %s32_s20), 0  ;;  %p107_p5 = scmp.eq.s32.totalorder %s568_s19, 1 }
   0xb   : > { %p843_p4 = por %p101_p2, %p100_p1  ;;  %s85_s23 = ssub.s32 %s768_s16, %s984_s20 }
   0xc   : > { %p571_p6 = scmp.ge.s32.totalorder %s772_s17, 1  ;;  %p88_p7 = scmp.eq.s32.totalorder %s85_s23, 0 }
   0xd   : > { %p850_p8 = por %p107_p5, %p106_p3  ;;  %p166_p9 = scmp.lt.s32.totalorder %s772_s17, 3 }
   0xe   : > { %s856_s25 = scalar_select %p88_p7, %s760_s14, %s90_s21  }
   0xf   : > { %p167_p10 = pnand %p571_p6, %p166_p9 }
  0x10   : > { %p197_p11 = scmp.lt.s32.totalorder (!%p167_p10), %s764_s15, 1  ;;  %s887_s6 = sand.u32 (!%p167_p10), 1, %s756_s13  }
  0x11   : > { %170 = sbr.rel (%p167_p10) target bundleno = 272 (0x110), region = 28  ;;  %s572_s7 = sshll.u32 (!%p167_p10), %s887_s6, 3 }
  0x12   : > { %s586_s8 = sshll.u32 (!%p167_p10), %s764_s15, 7  ;;  %s189_s9 = scalar_lea.vmem (!%p167_p10), [#allocation2], %s572_s7 }
  0x13   : > { %s449_s10 = sshll.u32 (!%p167_p10), %s189_s9, 4  ;;  %s196_s11 = scalar_lea.vmem (!%p167_p10), [#allocation4], %s572_s7  ;;  %s897_s10 = int_to_ptr.vmem [resolvable:$true] %s449_s10 }
  0x14   : > { %s463_s18 = sshll.u32 (!%p167_p10), %s196_s11, 4  ;;  %s894_s23 = scalar_lea.hbm (!%p167_p10), %s974_s2, %s586_s8  ;;  %s904_s18 = int_to_ptr.vmem [resolvable:$true] %s463_s18 }
  0x15   : > { %s430_s28 = scalar_lea.sflag (!%p167_p10), [#allocation3], %s887_s6  ;;  %s666_s29 = scalar_lea.vmem (!%p167_p10), %s897_s10, 128 }
  0x16   : > { %v774_v0 = vmov 0   ;;  %s198_s26 = scalar_select %p197_p11, %s764_s15, 1  ;;  %v575_v3 = vld [vmem:[%s973_s1] ss:$0 sm:$0xff]  ;;  %v775_v16 = vmov 683565275  }
  0x17   : > { %661 = vset.pattern.permute.xlu0 %v774_v0  ;;  %v776_v18 = vmov 2475754826   ;;  %v777_v21 = vmov 2131351028   ;;  %v778_v24 = vmov 2102212464   ;;  %p667_p12 = scmp.ne.s32.totalorder %s897_s10, %s666_s29 }
  0x18   : > { %s574_s27 = sshll.u32 %s198_s26, 3  ;;  %v779_v27 = vmov 920167782   ;;  %v780_v30 = vmov 1326507024   ;;  %vm426_vm10 = vcmask 261120  }
  0x19   : > { %s203_s30 = scalar_lea.vmem %s972_s0, %s574_s27  ;;  %s902_s27 = scalar_lea.hbm %s975_s3, %s586_s8 }
  0x1a   : > { %v204_v1 = vld [vmem:[%s203_s30] sm:$0xff]  ;;  %p668_p13 = pnand %p667_p12, %p843_p4  ;;  %s781_s30 = smov [#allocation2]  }
  0x1b   : > { %v205_v2 = vcvt.s32.f32 %v204_v1  ;;  %s670_s4 = sshll.u32 %s781_s30, 4  ;;  %s671_s4 = int_to_ptr.vmem [resolvable:$false] %s670_s4 }
  0x1c   : > { %p669_p0 = pneg %p668_p13  ;;  %s672_s5 = scalar_lea.vmem %s671_s4, 256 }
  0x1d   : > { %209 = vperm.xlu0 %661, %v205_v2   ;;  %p673_p1 = scmp.lt.s32.totalorder %s897_s10, %s671_s4  ;;  %p674_p2 = scmp.lt.s32.totalorder %s672_s5, %s666_s29 }
  0x1f   : > { %p675_p3 = por %p674_p2, %p673_p1 }
  0x21   : > { %p676_p5 = pnand %p675_p3, %p669_p0 }
  0x98   : > { %v210_v4 = vpop.permute.xlu0 %209 }
  0x99   : > { %v866_v5 = vmul.f32 %v575_v3, %v210_v4 }
  0x9b   : > { %v222_v6 = vand.u32 2139095040, %v866_v5  ;;  %v219_v10 = vand.u32 2147483647, %v866_v5  ;;  %vm221_vm7 = vcmp.lt.s32.totalorder %v866_v5, 0 }
  0x9d   : > { %v223_v7 = vshrl.u32 %v222_v6, 23  ;;  %v226_v13 = vand.u32 8388607, %v219_v10  ;;  %vm220_vm8 = vcmp.le.f32.partialorder %v219_v10, 0.7853982 }
  0x9f   : > { %v576_v8 = vadd.s32 4294967169, %v223_v7  ;;  %v227_v32 = vor.u32 8388608, %v226_v13 }
  0xa1   : > { %v229_v9 = vadd.s32 1, %v576_v8  ;;  %v267_v46 = vshll.u32 %v227_v32, 8 }
  0xa3   : > { %vm230_vm0 = vcmp.gt.s32.totalorder %v229_v9, 0 }
  0xa4   : > { %v231_v11 = vsel %vm230_vm0, %v229_v9, 0  ;;  %vm311_vm0 = vweird.f32 %v866_v5 }
  0xa5   : > { %v233_v12 = vand.u32 31, %v231_v11  ;;  %v232_v15 = vshrl.u32 %v231_v11, 5 }
  0xa7   : > { %v234_v14 = vsub.s32 32, %v233_v12  ;;  %v236_v17 = vshll.u32 %v775_v16, %v233_v12  ;;  %v239_v19 = vshll.u32 %v776_v18, %v233_v12  ;;  %v242_v23 = vshll.u32 %v777_v21, %v233_v12 }
  0xa8   : > { %v245_v26 = vshll.u32 %v778_v24, %v233_v12  ;;  %v248_v29 = vshll.u32 %v779_v27, %v233_v12  ;;  %vm251_vm1 = vcmp.lt.s32.totalorder %v232_v15, 1  ;;  %vm254_vm2 = vcmp.lt.s32.totalorder %v232_v15, 4 }
  0xa9   : > { %v237_v20 = vshrl.u32 %v776_v18, %v234_v14  ;;  %v240_v22 = vshrl.u32 %v777_v21, %v234_v14  ;;  %v243_v25 = vshrl.u32 %v778_v24, %v234_v14  ;;  %v246_v28 = vshrl.u32 %v779_v27, %v234_v14 }
  0xaa   : > { %v249_v31 = vshrl.u32 %v780_v30, %v234_v14  ;;  %v235_v41 = vshrl.u32 %v775_v16, %v234_v14  ;;  %vm253_vm3 = vcmp.lt.s32.totalorder %v232_v15, 3  ;;  %vm252_vm4 = vcmp.lt.s32.totalorder %v232_v15, 2 }
  0xab   : > { %v238_v33 = vor.u32 %v237_v20, %v236_v17  ;;  %v241_v34 = vor.u32 %v240_v22, %v239_v19  ;;  %v244_v35 = vor.u32 %v243_v25, %v242_v23  ;;  %v247_v36 = vor.u32 %v246_v28, %v245_v26 }
  0xac   : > { %v250_v37 = vor.u32 %v249_v31, %v248_v29 }
  0xad   : > { %v256_v38 = vsel %vm254_vm2, %v244_v35, 2102212464  ;;  %v259_v39 = vsel %vm251_vm1, %v238_v33, %v241_v34  ;;  %v263_v40 = vsel %vm251_vm1, %v241_v34, %v244_v35  ;;  %v260_v42 = vsel %vm254_vm2, %v247_v36, 920167782 }
  0xae   : > { %v264_v43 = vsel %vm254_vm2, %v250_v37, 1326507024  ;;  %v261_v44 = vsel %vm253_vm3, %v244_v35, %v260_v42  ;;  %v255_v47 = vsel %vm251_vm1, %v235_v41, %v238_v33  ;;  %v257_v48 = vsel %vm253_vm3, %v241_v34, %v256_v38 }
  0xaf   : > { %v265_v45 = vsel %vm253_vm3, %v247_v36, %v264_v43  ;;  %v262_v49 = vsel %vm252_vm4, %v259_v39, %v261_v44  ;;  %v258_v55 = vsel %vm252_vm4, %v255_v47, %v257_v48 }
  0xb0   : > { %v266_v50 = vsel %vm252_vm4, %v263_v40, %v265_v45  ;;  %v875_v53 = vmul.u32.u64.low %v267_v46, %v262_v49  ;;  %v876_v54 = vmul.u32.u64.high %v267_v46, %v262_v49, %v875_v53  ;;  %v274_v57 = vmul.u32 %v267_v46, %v258_v55 }
  0xb1   : > { %v872_v51 = vmul.u32.u64.low %v267_v46, %v266_v50  ;;  %v873_v52 = vmul.u32.u64.high %v267_v46, %v266_v50, %v872_v51 }
  0xb2   : > { %v277_v56 = vadd.s32 1, %v876_v54 }
  0xb3   : > { %vm276_vm5 = vc.u32 %v873_v52, %v875_v53  ;;  %v275_v6 = vadd.s32 %v875_v53, %v873_v52 }
  0xb4   : > { %v278_v58 = vsel %vm276_vm5, %v277_v56, %v876_v54 }
  0xb5   : > { %v279_v59 = vadd.s32 %v278_v58, %v274_v57 }
  0xb7   : > { %v280_v60 = vadd.s32 536870912, %v279_v59 }
  0xb9   : > { %v281_v61 = vshrl.u32 %v280_v60, 30 }
  0xbb   : > { %v282_v62 = vshll.u32 %v281_v61, 30  ;;  %v305_v20 = vsub.s32 4, %v281_v61 }
  0xbd   : > { %v283_v63 = vsub.s32 %v279_v59, %v282_v62  ;;  %v306_v23 = vsel %vm221_vm7, %v305_v20, %v281_v61 }
  0xbe   : > { %v308_v24 = vsel %vm220_vm8, 0, %v306_v23 }
  0xbf   : > { %v285_v0 = vsub.s32 0, %v283_v63  ;;  %v415_v25 = vadd.s32 3, %v308_v24  ;;  %v312_v26 = vand.u32 3, %v308_v24 }
  0xc1   : > { %v577_v1 = vmin.u32 %v285_v0, %v283_v63  ;;  %v416_v27 = vand.u32 3, %v415_v25  ;;  %vm317_vm9 = vcmp.eq.s32.totalorder %v312_v26, 2  ;;  %vm314_vm12 = vcmp.eq.s32.totalorder %v312_v26, 0 }
  0xc2   : > { %vm313_vm14 = vcmp.lt.s32.totalorder %v312_v26, 2 }
  0xc3   : > { %v287_v2 = vclz %v577_v1  ;;  %vm421_vm11 = vcmp.eq.s32.totalorder %v416_v27, 2  ;;  %vm418_vm13 = vcmp.eq.s32.totalorder %v416_v27, 0  ;;  %vm417_vm15 = vcmp.lt.s32.totalorder %v416_v27, 2 }
  0xc5   : > { %v578_v3 = vadd.s32 4294967294, %v287_v2 }
  0xc7   : > { %vm579_vm6 = vcmp.lt.s32.totalorder %v578_v3, 0 }
  0xc8   : > { %v290_v4 = vsel %vm579_vm6, 0, %v578_v3 }
  0xc9   : > { %v291_v7 = vsub.s32 32, %v290_v4  ;;  %v295_v8 = vsub.s32 4294967266, %v290_v4  ;;  %v292_v9 = vshll.u32 %v283_v63, %v290_v4 }
  0xcb   : > { %v293_v11 = vshrl.u32 %v275_v6, %v291_v7  ;;  %v296_v12 = vadd.s32 127, %v295_v8 }
  0xcd   : > { %v294_v13 = vor.u32 %v293_v11, %v292_v9  ;;  %v297_v14 = vshll.u32 %v296_v12, 23 }
  0xcf   : > { %v298_v15 = vor.u32 4788187, %v297_v14  ;;  %v301_v17 = vcvt.s32.f32 %v294_v13 }
  0xd1   : > { %v299_v16 = vand.u32 2147483647, %v298_v15 }
  0xd3   : > { %v302_v18 = vmul.f32 %v301_v17, %v299_v16 }
  0xd5   : > { %v303_v19 = vxor.u32 2147483648, %v302_v18 }
  0xd7   : > { %v304_v21 = vsel %vm221_vm7, %v303_v19, %v302_v18 }
  0xd8   : > { %v307_v22 = vsel %vm220_vm8, %v866_v5, %v304_v21 }
  0xd9   : > { %662 = vcosq.f32 %v307_v22 }
  0xda   : > { %664 = vsinq.f32 %v307_v22 }
  0xe6   : > { %v663_v28 = vpop.eup %662 }
  0xe7   : > { %v665_v29 = vpop.eup %664  ;;  %v318_v30 = vxor.u32 2147483648, %v663_v28 }
  0xe8   : > { %v315_v31 = vxor.u32 2147483648, %v665_v29 }
  0xe9   : > { %v319_v10 = vsel %vm317_vm9, %v318_v30, %v665_v29  ;;  %v423_v32 = vsel %vm421_vm11, %v318_v30, %v665_v29 }
  0xea   : > { %v316_v33 = vsel %vm314_vm12, %v663_v28, %v315_v31  ;;  %v420_v34 = vsel %vm418_vm13, %v663_v28, %v315_v31 }
  0xeb   : > { %v320_v35 = vsel %vm313_vm14, %v316_v33, %v319_v10  ;;  %v424_v36 = vsel %vm417_vm15, %v420_v34, %v423_v32 }
  0xec   : > { %v321_v37 = vsel %vm311_vm0, nan, %v320_v35  ;;  %v425_v38 = vsel %vm311_vm0, nan, %v424_v36 }
  0xed   : > { %427 = vst.msk [vmem:[%s189_s9] sm:$0xff] %vm426_vm10, %v321_v37  ;;  %428 = vst.msk [vmem:[%s196_s11] sm:$0xff] %vm426_vm10, %v425_v38 }
  0xee   : > { %679 = shalt.err (!%p676_p5)
}
  0xef   : > { %s680_s7 = scalar_lea.hbm %s894_s23, 128  ;;  %s684_s11 = scalar_lea.hbm %s974_s2, 256 }
  0xf0   : > { %p681_p6 = scmp.ne.s32.totalorder %s894_s23, %s680_s7  ;;  %p685_p10 = scmp.lt.s32.totalorder %s894_s23, %s974_s2 }
  0xf1   : > { %p686_p11 = scmp.lt.s32.totalorder %s684_s11, %s680_s7 }
  0xf2   : > { %p682_p7 = pnand %p681_p6, %p843_p4 }
  0xf3   : > { %p687_p12 = por %p686_p11, %p685_p10 }
  0xf4   : > { %p683_p9 = pneg %p682_p7 }
  0xf6   : > { %p688_p13 = pnand %p687_p12, %p683_p9 }
  0xf8   : > { %691 = shalt.err (!%p688_p13)
}
  0xf9   : > { %594 = dma.vmem_to_hbm [thread:$0]  (%p843_p4), %s897_s10, 128, %s894_s23, %s430_s28  }
  0xfa   : > { %s435_s15 = scalar_lea.sflag [#allocation5], %s887_s6  ;;  %s692_s26 = scalar_lea.vmem %s904_s18, 128 }
  0xfb   : > { %p693_p0 = scmp.ne.s32.totalorder %s904_s18, %s692_s26  ;;  %s782_s29 = smov [#allocation4]  }
  0xfc   : > { %s696_s30 = sshll.u32 %s782_s29, 4  ;;  %s697_s30 = int_to_ptr.vmem [resolvable:$false] %s696_s30 }
  0xfd   : > { %p694_p1 = pnand %p693_p0, %p843_p4  ;;  %s698_s4 = scalar_lea.vmem %s697_s30, 256 }
  0xfe   : > { %p699_p3 = scmp.lt.s32.totalorder %s904_s18, %s697_s30  ;;  %p700_p5 = scmp.lt.s32.totalorder %s698_s4, %s692_s26 }
  0xff   : > { %p695_p2 = pneg %p694_p1 }
 0x100   : > { %p701_p6 = por %p700_p5, %p699_p3 }
 0x102   : > { %p702_p7 = pnand %p701_p6, %p695_p2 }
 0x104   : > { %705 = shalt.err (!%p702_p7)
}
 0x105   : > { %s706_s10 = scalar_lea.hbm %s902_s27, 128  ;;  %s710_s28 = scalar_lea.hbm %s975_s3, 256 }
 0x106   : > { %p707_p9 = scmp.ne.s32.totalorder %s902_s27, %s706_s10  ;;  %p711_p12 = scmp.lt.s32.totalorder %s902_s27, %s975_s3 }
 0x107   : > { %p712_p13 = scmp.lt.s32.totalorder %s710_s28, %s706_s10 }
 0x108   : > { %p708_p10 = pnand %p707_p9, %p843_p4 }
 0x109   : > { %p713_p0 = por %p712_p13, %p711_p12 }
 0x10a   : > { %p709_p11 = pneg %p708_p10 }
 0x10c   : > { %p714_p1 = pnand %p713_p0, %p709_p11 }
 0x10e   : > { %717 = shalt.err (!%p714_p1)
}
 0x10f   : > { %595 = dma.vmem_to_hbm [thread:$0]  (%p843_p4), %s904_s18, 128, %s902_s27, %s435_s15  }
 0x110 PF: > { %p605_p2 = scmp.ge.s32.totalorder %s772_s17, 2  ;;  %s475_s8 = sand.u32 1, %s752_s12  }
 0x111   : > { %s476_s9 = scalar_lea.sflag [#allocation3], %s475_s8 }
 0x112   : > { %p599_p3 = pnand %p605_p2, %p850_p8 }
 0x114   : > { %p600_p5 = pneg %p599_p3 }
 0x116   : > { %743 = dma.done.wait (%p600_p5), %s476_s9, 128  }
 0x117   : > { %745 = vsyncadd (%p600_p5), %s476_s9, 4294967168  ;;  %s485_s11 = scalar_lea.sflag [#allocation5], %s475_s8 }
 0x118   : > { %747 = dma.done.wait (%p600_p5), %s485_s11, 128  }
 0x119   : > { %749 = vsyncadd (%p600_p5), %s485_s11, 4294967168  ;;  %s20_s17 = sadd.s32 1, %s772_s17   ;;  %s978_s12 = smov %s756_s13 }
 0x11a   : > { %p17_p6 = scmp.ge.s32.totalorder %s20_s17, 4   ;;  %s979_s13 = smov %s760_s14 }
 0x11b   : > { %s980_s14 = smov %s856_s25  ;;  %s981_s15 = smov %s768_s16 }
 0x11c   : > { %s982_s16 = smov %s984_s20  ;;  %19 = sbr.rel (!%p17_p6) target bundleno = 6 (0x6), region = 80 }
 0x121   :  { %490 = vsyncpa [#allocation3], 1 }
 0x122   :  { %492 = vsyncpa [#allocation3 + $0x1], 1 }
 0x123   :  { %493 = vsyncpa [#allocation5], 1 }
 0x124   :  { %495 = vsyncpa [#allocation5 + $0x1], 1 }

</bundles_post_ra>
